<compile_context>
chip_gen: v5e
topology: v5e:2x2
jax: 0.10.0
libtpu: 0.0.40
codegen_flags: <defaults>
</compile_context>

<pallas_src>
import jax
import jax.numpy as jnp
from jax import lax
from jax.experimental import pallas as pl
from jax.experimental.pallas import tpu as pltpu


def _inter_attention_kernel(enc_ref, dec_ref, out_ref):
    # enc_ref: (TB, S, H)   dec_ref: (TB, 1, H)   out_ref: (TB, S)
    enc = enc_ref[...]
    dec = dec_ref[...]

    if enc.dtype == jnp.float32:
        # Exact f32 path: VPU multiply + f32 reduce over the hidden dim.
        # No upcast copy exists for f32 inputs and the result matches the
        # pure-f32 reference bit-for-bit (modulo reduce order).
        scores = jnp.sum(enc * dec, axis=2)                        # (TB, S) f32
    else:
        # bf16/fp16 path: batched matvec on the MXU (dec x enc^T).
        # Narrow inputs are consumed natively, accumulation is f32, no
        # (TB, S, H) f32 temporary is materialized, and S stays on lanes.
        scores = lax.dot_general(
            dec, enc,
            dimension_numbers=(((2,), (2,)), ((0,), (0,))),
            preferred_element_type=jnp.float32,
        )[:, 0, :]                                                 # (TB, S) f32

    # Numerically-stable softmax over the sequence dim (PyTorch softmax dim=1).
    m = jnp.max(scores, axis=1, keepdims=True)                     # (TB, 1)
    e = jnp.exp(scores - m)
    denom = jnp.sum(e, axis=1, keepdims=True)
    # Exact divide (DMA-bound kernel; approx reciprocal was not accurate enough).
    out_ref[...] = (e / denom).astype(out_ref.dtype)


def _choose_batch_tile(B, S, H, itemsize, target_bytes=8 * 1024 * 1024):
    """Pick TB (batch rows per grid step).

    Constraints:
      * TB must divide B exactly.
      * TB lands in the sublane dim of the (TB, S) output block, so it must be
        a multiple of 8 OR equal to B (full-extent block dims are always legal).
      * Encoder tile TB*S*H*itemsize targeted at ~8 MiB so the ~0.35 us
        per-step pipeline overhead is amortized while 2-deep buffering still
        fits comfortably in v7x's 64 MiB VMEM.
    """
    per_batch = max(S * H * itemsize, 1)
    # Divisors of B that are multiples of 8 (sublane-aligned), largest first.
    aligned = [d for d in range(8 * (B // 8), 0, -8) if B % d == 0]
    for d in aligned:
        if d * per_batch <= target_bytes:
            return d              # largest aligned tile within the target
    if aligned:
        return aligned[-1]        # every aligned tile exceeds the target: take
                                  # the smallest aligned one (still layout-legal)
    # No multiple-of-8 divisor (small / odd B): use the full batch; full-extent
    # block dims are always layout-legal.
    # TODO(synk): add an S-tiled online-softmax path for a single batch row
    # whose (S, H) slab does not fit in VMEM.
    return B


def inter_attention_forward(decoder_curr, encoder_output):
    """decoder_curr: (B, 1, H), encoder_output: (B, S, H) -> (B, S) float32.
    Inputs may be float32 or bfloat16 (bf16 halves HBM traffic and uses the MXU
    score path)."""
    B, S, H = encoder_output.shape
    assert decoder_curr.shape == (B, 1, H)
    assert decoder_curr.dtype == encoder_output.dtype

    itemsize = jnp.dtype(encoder_output.dtype).itemsize
    tb = _choose_batch_tile(B, S, H, itemsize)
    grid = (B // tb,)

    # VMEM guardrail derived from the actual footprint: double-buffered
    # enc/dec/out tiles plus headroom for in-kernel f32 temporaries; capped
    # below v7x's 64 MiB physical VMEM (also fine on v5e/v6e's 128 MiB).
    enc_tile = tb * S * H * itemsize
    dec_tile = tb * H * itemsize
    out_tile = tb * S * 4
    vmem_limit = 2 * (enc_tile + dec_tile + out_tile) + tb * S * H * 4 + (8 << 20)
    vmem_limit = int(min(max(vmem_limit, 16 << 20), 56 << 20))

    return pl.pallas_call(
        _inter_attention_kernel,
        out_shape=jax.ShapeDtypeStruct((B, S), jnp.float32),
        grid_spec=pl.GridSpec(
            grid=grid,
            in_specs=[
                # encoder: the bandwidth-critical stream (default 2-deep pipeline)
                pl.BlockSpec((tb, S, H), lambda b: (b, 0, 0)),
                # decoder: tiny per-step query tile
                pl.BlockSpec((tb, 1, H), lambda b: (b, 0, 0)),
            ],
            out_specs=pl.BlockSpec((tb, S), lambda b: (b, 0)),
        ),
        compiler_params=pltpu.CompilerParams(
            dimension_semantics=("parallel",),   # independent batch tiles -> TCs
            vmem_limit_bytes=vmem_limit,
        ),
    )(encoder_output, decoder_curr)


class InterAttentionPallas:
    """Mirror of the PyTorch module. The linear layer's parameters are created
    (as in __init__) but — matching the reference forward — are not used."""

    def __init__(self, hidden_dim, key):
        self.hidden_dim = hidden_dim
        kw, kb = jax.random.split(key)
        bound = 1.0 / float(hidden_dim) ** 0.5
        # nn.Linear(hidden_dim, hidden_dim) parameters (unused in forward)
        self.linear_w = jax.random.uniform(
            kw, (hidden_dim, hidden_dim), jnp.float32, -bound, bound)
        self.linear_b = jax.random.uniform(
            kb, (hidden_dim,), jnp.float32, -bound, bound)

    def __call__(self, decoder_curr, encoder_output):
        return inter_attention_forward(decoder_curr, encoder_output)


if __name__ == "__main__":
    key = jax.random.PRNGKey(0)
    k_mod, k_enc, k_dec = jax.random.split(key, 3)

    B, S, H = 2, 8, 32
    module = InterAttentionPallas(H, k_mod)

    encoder_output = jax.random.normal(k_enc, (B, S, H), jnp.float32)
    decoder_curr = jax.random.normal(k_dec, (B, 1, H), jnp.float32)

    # f32 path (exact VPU scores)
    out = jax.block_until_ready(module(decoder_curr, encoder_output))
    ref = jax.nn.softmax(
        jnp.sum(encoder_output * decoder_curr, axis=2), axis=1)
    assert out.shape == (B, S)
    assert jnp.allclose(out, ref, atol=1e-5, rtol=1e-5)

    # bf16 path (MXU scores with f32 accumulation) — compare against the same
    # bf16 values upcast to f32.
    enc_bf16 = encoder_output.astype(jnp.bfloat16)
    dec_bf16 = decoder_curr.astype(jnp.bfloat16)
    out_bf16 = jax.block_until_ready(module(dec_bf16, enc_bf16))
    ref_bf16 = jax.nn.softmax(
        jnp.sum(enc_bf16.astype(jnp.float32) * dec_bf16.astype(jnp.float32),
                axis=2), axis=1)
    assert out_bf16.shape == (B, S)
    assert jnp.allclose(out_bf16, ref_bf16, atol=1e-4, rtol=1e-4)

    print("KERNEL_OK")
</pallas_src>

<mosaic_0001>
module attributes {stable_mosaic.version = 11 : i64} {
  func.func @_inter_attention_kernel(%arg0: i32, %arg1: memref<2x8x32xf32, #tpu.memory_space<vmem>>, %arg2: memref<2x1x32xf32, #tpu.memory_space<vmem>>, %arg3: memref<2x8xf32, #tpu.memory_space<vmem>>) attributes {dimension_semantics = [#tpu.dimension_semantics<parallel>], iteration_bounds = array<i64: 1>, scalar_prefetch = 0 : i64, scratch_operands = 0 : i64, tpu.core_type = #tpu.core_type<tc>, window_params = [{transform_indices = @transform_0, window_bounds = array<i64: 2, 8, 32>}, {transform_indices = @transform_1, window_bounds = array<i64: 2, 1, 32>}, {transform_indices = @transform_2, window_bounds = array<i64: 2, 8>}]} {
    %c0 = arith.constant 0 : index
    %c0_0 = arith.constant 0 : index
    %c0_1 = arith.constant 0 : index
    %0 = vector.load %arg1[%c0, %c0_0, %c0_1] : memref<2x8x32xf32, #tpu.memory_space<vmem>>, vector<2x8x32xf32>
    %c0_2 = arith.constant 0 : index
    %c0_3 = arith.constant 0 : index
    %c0_4 = arith.constant 0 : index
    %1 = vector.load %arg2[%c0_2, %c0_3, %c0_4] : memref<2x1x32xf32, #tpu.memory_space<vmem>>, vector<2x1x32xf32>
    %2 = vector.broadcast %1 : vector<2x1x32xf32> to vector<2x8x32xf32>
    %3 = arith.mulf %0, %2 : vector<2x8x32xf32>
    %cst = arith.constant dense<0.000000e+00> : vector<2x8xf32>
    %4 = vector.multi_reduction <add>, %3, %cst [2] : vector<2x8x32xf32> to vector<2x8xf32>
    %cst_5 = arith.constant dense<0xFF800000> : vector<2xf32>
    %5 = vector.multi_reduction <maximumf>, %4, %cst_5 [1] : vector<2x8xf32> to vector<2xf32>
    %6 = vector.shape_cast %5 : vector<2xf32> to vector<2x1xf32>
    %7 = vector.broadcast %6 : vector<2x1xf32> to vector<2x8xf32>
    %8 = arith.subf %4, %7 : vector<2x8xf32>
    %9 = math.exp %8 : vector<2x8xf32>
    %cst_6 = arith.constant dense<0.000000e+00> : vector<2xf32>
    %10 = vector.multi_reduction <add>, %9, %cst_6 [1] : vector<2x8xf32> to vector<2xf32>
    %11 = vector.shape_cast %10 : vector<2xf32> to vector<2x1xf32>
    %12 = vector.broadcast %11 : vector<2x1xf32> to vector<2x8xf32>
    %13 = arith.divf %9, %12 : vector<2x8xf32>
    %c0_7 = arith.constant 0 : index
    %c0_8 = arith.constant 0 : index
    %14 = vector.load %arg3[%c0_7, %c0_8] : memref<2x8xf32, #tpu.memory_space<vmem>>, vector<2x8xf32>
    tpu.vector_store %arg3[%c0_7, %c0_8], %13 {strides = array<i32>} : memref<2x8xf32, #tpu.memory_space<vmem>>, vector<2x8xf32>,
    return
  }
  func.func @transform_0(%arg0: i32) -> (i32, i32, i32) {
    %c0_i32 = arith.constant 0 : i32
    %c0_i32_0 = arith.constant 0 : i32
    %c0_i32_1 = arith.constant 0 : i32
    return %arg0, %c0_i32, %c0_i32_0 : i32, i32, i32
  }
  func.func @transform_1(%arg0: i32) -> (i32, i32, i32) {
    %c0_i32 = arith.constant 0 : i32
    %c0_i32_0 = arith.constant 0 : i32
    %c0_i32_1 = arith.constant 0 : i32
    return %arg0, %c0_i32, %c0_i32_0 : i32, i32, i32
  }
  func.func @transform_2(%arg0: i32) -> (i32, i32) {
    %c0_i32 = arith.constant 0 : i32
    %c0_i32_0 = arith.constant 0 : i32
    return %arg0, %c0_i32 : i32, i32
  }
}

</mosaic_0001>

<bundles_post_ra>
// kernel: tpu_custom_call.1
= control target key start
LH: loop header
LB: loop body
LE: loop exit
PB: predicated region body
PF: predicated region fallthrough
CT: control target
= control target key end

     0   :  { %7 = vsyncpa [#allocation3], 0  ;;  %s313_s0 = inlined_call_operand.hbm [shape: f32[2,8,32], index: 0, kind: input, shape index: {}]   ;;  %s314_s1 = inlined_call_operand.hbm [shape: f32[2,1,32], index: 1, kind: input, shape index: {}]   ;;  %s315_s2 = inlined_call_operand.hbm [shape: f32[2,8], index: 2, kind: output, shape index: {}]  }
   0x1   :  { %8 = vsyncpa [#allocation6], 0 }
   0x2   :  { %9 = vsyncpa [#allocation4], 0  ;;  %s14_s11 = sshll.u32 %s313_s0, 4  ;;  %s267_s12 = smov [#allocation2]   ;;  %s15_s11 = int_to_ptr.hbm [resolvable:$true] %s14_s11 }
   0x3   :  { %s16_s13 = sshll.u32 %s267_s12, 4  ;;  %s27_s16 = sshll.u32 %s314_s1, 4  ;;  %s17_s13 = int_to_ptr.vmem [resolvable:$true] %s16_s13  ;;  %s28_s16 = int_to_ptr.hbm [resolvable:$true] %s27_s16 }
   0x4   :  { %s268_s17 = smov 128   ;;  %s269_s18 = smov 8  }
   0x5   :  { %22 = dma.hbm_to_vmem [thread:$0]  %s15_s11, 256, %s17_s13, [#allocation3], %s268_s17, %s268_s17, %s269_s18  }
   0x6   :  { %s270_s19 = smov [#allocation5]   ;;  %s271_s21 = smov 16  }
   0x7   :  { %s29_s20 = sshll.u32 %s270_s19, 4  ;;  %s272_s22 = smov 1   ;;  %s30_s20 = int_to_ptr.vmem [resolvable:$true] %s29_s20 }
   0x8   :  { %35 = dma.hbm_to_vmem [thread:$0]  %s28_s16, 32, %s30_s20, [#allocation6], %s271_s21, %s271_s21, %s272_s22  }
   0x9   :  { %261 = dma.done.wait [#allocation3], 256  }
   0xa   :  { %262 = vsyncadd [#allocation3], 4294967040 }
   0xb   :  { %263 = dma.done.wait [#allocation6], 32  }
   0xc   :  { %264 = vsyncadd [#allocation6], 4294967264  ;;  %v44_v0 = vld [vmem:[#allocation2] sm:$0xff]  ;;  %v179_v1 = vld [vmem:[#allocation5] ss:$0 sm:$0xff]  ;;  %vm56_vm0 = vcmask 261120   ;;  %v65_v9 = vlaneseq }
   0xd   :  { %v54_v2 = vmul.f32 %v179_v1, %v44_v0  ;;  %v180_v3 = vld [vmem:[#allocation5 + $0x1] ss:$0 sm:$0xff]  ;;  %v45_v4 = vld [vmem:[#allocation2 + $0x8] sm:$0xff]  ;;  %vm69_vm1 = vcmask 1041409   ;;  %vm72_vm2 = vcmask 58368   ;;  %v273_v16 = vmov 0  }
   0xe   :  { %v55_v6 = vmul.f32 %v180_v3, %v45_v4  ;;  %v296_v10 = vand.u32 127, %v65_v9  ;;  %177 = vset.pattern.permute.xlu2 %v273_v16  ;;  %176 = vset.pattern.permute.xlu1 %v273_v16  ;;  %s274_s0 = smov [#allocation7]   ;;  %s157_s25 = sshll.u32 %s315_s2, 4  ;;  %s158_s25 = int_to_ptr.hbm [resolvable:$true] %s157_s25 }
   0xf   :  { %v57_v5 = vsel %vm56_vm0, %v54_v2, 0.0  ;;  %178 = vset.pattern.permute.xlu0 %v273_v16  ;;  %s155_s1 = sshll.u32 %s274_s0, 4  ;;  %s156_s1 = int_to_ptr.vmem [resolvable:$true] %s155_s1 }
  0x10   :  { %58 = vadd.xlane.f32.xlu0 %v57_v5  ;;  %v60_v7 = vsel %vm56_vm0, %v55_v6, 0.0 }
  0x18   :  { %61 = vadd.xlane.f32.xlu0 %v60_v7 }
  0x83   :  { %v59_v8 = vpop.xlane.xlu0 %58 }
  0x84   :  { %v67_v12 = vperm.slane %v59_v8, %v296_v10 }
  0x8b   :  { %v62_v11 = vpop.xlane.xlu0 %61 }
  0x8c   :  { %v68_v13 = vperm.slane %v62_v11, %v296_v10 }
  0x8e   :  { %v70_v14 = vsel %vm69_vm1, %v68_v13, %v67_v12 }
  0x8f   :  { %v73_v15 = vsel %vm72_vm2, %v70_v14, -inf }
  0x90   :  { %74 = vmax.xlane.f32.xlu1 %v73_v15 }
 0x103   :  { %v75_v17 = vpop.xlane.xlu1 %74 }
 0x104   :  { %v77_v18 = vperm.slane %v75_v17, 0  ;;  %v78_v19 = vperm.slane %v75_v17, 1 }
 0x106   :  { %v81_v20 = vsub.f32 %v59_v8, %v77_v18  ;;  %v82_v21 = vsub.f32 %v62_v11, %v78_v19 }
 0x108   :  { %v83_v22 = vmul.f32 1.442695, %v81_v20  ;;  %v85_v23 = vmul.f32 1.442695, %v82_v21 }
 0x10a   :  { %181 = vpow2.f32 %v83_v22 }
 0x10b   :  { %183 = vpow2.f32 %v85_v23 }
 0x110   :  { %v182_v24 = vpop.eup %181 }
 0x111   :  { %v184_v25 = vpop.eup %183  ;;  %90 = vperm.xlu1 %176, %v182_v24  }
 0x112   :  { %93 = vperm.xlu2 %177, %v184_v25  }
 0x16c   :  { %v94_v26 = vpop.permute.xlu2 %93 }
 0x16d   :  { %v96_v28 = vperm.slane %v94_v26, %v296_v10 }
 0x183   :  { %v91_v27 = vpop.permute.xlu1 %90 }
 0x184   :  { %v95_v29 = vperm.slane %v91_v27, %v296_v10 }
 0x186   :  { %v97_v30 = vsel %vm69_vm1, %v96_v28, %v95_v29 }
 0x187   :  { %v99_v31 = vsel %vm72_vm2, %v97_v30, 0.0 }
 0x188   :  { %100 = vadd.xlane.f32.xlu2 %v99_v31 }
 0x1fb   :  { %v101_v32 = vpop.xlane.xlu2 %100 }
 0x1fc   :  { %v103_v33 = vperm.slane %v101_v32, 0  ;;  %v104_v34 = vperm.slane %v101_v32, 1 }
 0x1fe   :  { %185 = vrcp.f32 %v103_v33  ;;  %v118_v41 = vand.u32 2147483648, %v103_v33  ;;  %v133_v42 = vand.u32 2147483648, %v104_v34  ;;  %v116_v44 = vand.u32 2147483647, %v103_v33 }
 0x1ff   :  { %187 = vrcp.f32 %v104_v34  ;;  %v131_v46 = vand.u32 2147483647, %v104_v34  ;;  %vm112_vm5 = vweird.f32 %v103_v33  ;;  %vm127_vm6 = vweird.f32 %v104_v34 }
 0x200   :  { %v119_v49 = vor.u32 1.1754944e-38, %v118_v41  ;;  %v134_v50 = vor.u32 1.1754944e-38, %v133_v42  ;;  %vm117_vm9 = vcmp.eq.f32.partialorder %v116_v44, 8.507059e+37 }
 0x201   :  { %vm132_vm10 = vcmp.eq.f32.partialorder %v131_v46, 8.507059e+37 }
 0x204   :  { %v186_v35 = vpop.eup %185 }
 0x205   :  { %v188_v36 = vpop.eup %187  ;;  %v108_v37 = vmul.f32 %v186_v35, %v103_v33  ;;  %vm113_vm3 = vweird.f32 %v186_v35 }
 0x206   :  { %v123_v38 = vmul.f32 %v188_v36, %v104_v34  ;;  %vm128_vm4 = vweird.f32 %v188_v36  ;;  %vm114_vm7 = vmor %vm112_vm5, %vm113_vm3 }
 0x207   :  { %v109_v39 = vsub.f32 1.0, %v108_v37  ;;  %vm129_vm8 = vmor %vm127_vm6, %vm128_vm4 }
 0x208   :  { %v124_v40 = vsub.f32 1.0, %v123_v38 }
 0x209   :  { %v110_v43 = vmul.f32 %v186_v35, %v109_v39 }
 0x20a   :  { %v125_v45 = vmul.f32 %v188_v36, %v124_v40 }
 0x20b   :  { %v111_v47 = vadd.f32 %v186_v35, %v110_v43 }
 0x20c   :  { %v126_v48 = vadd.f32 %v188_v36, %v125_v45 }
 0x20d   :  { %v115_v51 = vsel %vm114_vm7, %v186_v35, %v111_v47 }
 0x20e   :  { %v130_v52 = vsel %vm129_vm8, %v188_v36, %v126_v48  ;;  %v120_v53 = vsel %vm117_vm9, %v119_v49, %v115_v51 }
 0x20f   :  { %v135_v54 = vsel %vm132_vm10, %v134_v50, %v130_v52  ;;  %v121_v55 = vmul.f32 %v182_v24, %v120_v53 }
 0x210   :  { %v136_v56 = vmul.f32 %v184_v25, %v135_v54 }
 0x211   :  { %140 = vperm.xlu0 %178, %v121_v55  }
 0x212   :  { %143 = vperm.xlu1 %176, %v136_v56  }
 0x283   :  { %v141_v57 = vpop.permute.xlu0 %140 }
 0x284   :  { %v144_v58 = vpop.permute.xlu1 %143  ;;  %v145_v59 = vperm.slane %v141_v57, %v296_v10 }
 0x285   :  { %v146_v60 = vperm.slane %v144_v58, %v296_v10 }
 0x287   :  { %v147_v61 = vsel %vm69_vm1, %v146_v60, %v145_v59 }
 0x288   :  { %149 = vst.msk [vmem:[#allocation7] sm:$0x3] %vm72_vm2, %v147_v61 }
 0x289   :  { %160 = dma.vmem_to_hbm [thread:$0]  %s156_s1, 32, %s158_s25, [#allocation4]  }
 0x28a   :  { %265 = dma.done.wait [#allocation4], 32  }
 0x28b   :  { %266 = vsyncadd [#allocation4], 4294967264 }
 0x28c   :  { %165 = vsyncpa [#allocation3], 1 }
 0x28d   :  { %166 = vsyncpa [#allocation6], 1 }
 0x28e   :  { %167 = vsyncpa [#allocation4], 1 }

</bundles_post_ra>
